<compile_context>
chip_gen: v7x
topology: tpu7x:2x2x1
jax: 0.10.0
libtpu: 0.0.40
codegen_flags: <defaults>
</compile_context>

<pallas_src>
import functools

import jax
import jax.numpy as jnp
from jax import lax
from jax.experimental import pallas as pl
from jax.experimental.pallas import tpu as pltpu

EPS = 1e-6
_LANE = 128


def _round_up(x, m):
    return ((x + m - 1) // m) * m


def _cosine_loss_kernel(pred_ref, label_ref, out_ref, acc_ref, *,
                        C, G, rows_valid, inv_rows, need_mask):
    """Grid = (num_outer[parallel], num_inner[arbitrary]).

    pred_ref / label_ref : (TR, G*C) tile; each tile row packs G consecutive
                           original rows of C channels (G == 1 => plain rows).
    out_ref              : (1, 8, 128) per-partition partial mean.
    acc_ref              : (TR, G) VMEM accumulator of per-row cosines.
    """
    c = pl.program_id(0)
    i = pl.program_id(1)

    @pl.when(i == 0)
    def _init():
        acc_ref[...] = jnp.zeros_like(acc_ref)

    p = pred_ref[...].astype(jnp.float32)          # (TR, G*C)
    l = label_ref[...].astype(jnp.float32)

    e = p * l
    pp = p * p
    ll = l * l

    if G == 1:
        # General path: reduce the (full) last dim directly.
        dot = jnp.sum(e, axis=-1, keepdims=True)   # (TR, 1)
        sp = jnp.sum(pp, axis=-1, keepdims=True)
        sl = jnp.sum(ll, axis=-1, keepdims=True)
    else:
        # Packed path: segmented lane-sum via a 0/1 matrix on the MXU.
        W = G * C
        k_idx = lax.broadcasted_iota(jnp.int32, (W, G), 0)
        g_idx = lax.broadcasted_iota(jnp.int32, (W, G), 1)
        seg = jnp.logical_and(k_idx >= g_idx * C, k_idx < (g_idx + 1) * C)
        seg = seg.astype(jnp.float32)              # (W, G), S[k,g] = (k//C == g)
        dot = jnp.dot(e, seg, preferred_element_type=jnp.float32,
                      precision=lax.Precision.HIGHEST)      # (TR, G)
        sp = jnp.dot(pp, seg, preferred_element_type=jnp.float32,
                     precision=lax.Precision.HIGHEST)
        sl = jnp.dot(ll, seg, preferred_element_type=jnp.float32,
                     precision=lax.Precision.HIGHEST)

    # max(sqrt(sp*sl), eps) == sqrt(max(sp*sl, eps^2))  ->  single EUP rsqrt.
    cos = dot * lax.rsqrt(jnp.maximum(sp * sl, jnp.float32(EPS * EPS)))

    if need_mask:
        tr = cos.shape[0]
        row0 = (c * pl.num_programs(1) + i) * tr
        rid = row0 + lax.broadcasted_iota(jnp.int32, cos.shape, 0)
        # Select (not multiply) so garbage/NaN in the ragged tail is squashed.
        cos = jnp.where(rid < rows_valid, cos, 0.0)

    acc_ref[...] += cos                            # cheap VPU add, no reduce

    @pl.when(i == pl.num_programs(1) - 1)
    def _finish():
        partial = jnp.sum(acc_ref[...]) * jnp.float32(inv_rows)
        out_ref[...] = jnp.full(out_ref.shape, partial, dtype=out_ref.dtype)


def cosine_loss(pred, label, *, block_bytes=2 * 1024 * 1024):
    """pred, label: (B, N, C). Returns mean(cosine_similarity(pred, label, dim=2))."""
    assert pred.shape == label.shape and pred.ndim == 3
    B, N, C = pred.shape
    rows = B * N

    # Pack G consecutive rows into one 128-lane register row when possible.
    if C < _LANE and _LANE % C == 0 and rows % (_LANE // C) == 0:
        G = _LANE // C
    else:
        G = 1
    W = G * C
    rows_p = rows // G

    # Free reshapes (row-major contiguous).
    pred2 = pred.reshape(rows_p, W)
    label2 = label.reshape(rows_p, W)

    # Row tile: as large as a ~block_bytes VMEM block allows (multiple of 8),
    # or the whole row range if it already fits in one tile.
    lanes = _round_up(W, _LANE)                    # VMEM lane padding
    cap = max(8, (block_bytes // (lanes * 4)) // 8 * 8)
    tr = rows_p if rows_p <= cap else cap
    num_steps = -(-rows_p // tr)                   # ceil

    # Split the row stream over two partitions only when it divides evenly so
    # the grid covers exactly cdiv(rows_p, tr) tiles (v7x megacore; no-op else).
    if num_steps >= 2 and num_steps % 2 == 0:
        num_outer, num_inner = 2, num_steps // 2
    else:
        num_outer, num_inner = 1, num_steps

    kernel = functools.partial(
        _cosine_loss_kernel,
        C=C, G=G, rows_valid=rows_p, inv_rows=1.0 / rows,
        need_mask=(rows_p % tr != 0))

    def in_map(c, i):
        return (c * num_inner + i, 0)

    out = pl.pallas_call(
        kernel,
        out_shape=jax.ShapeDtypeStruct((num_outer, 8, 128), jnp.float32),
        grid_spec=pltpu.PrefetchScalarGridSpec(
            num_scalar_prefetch=0,
            grid=(num_outer, num_inner),
            in_specs=[
                pl.BlockSpec((tr, W), in_map),
                pl.BlockSpec((tr, W), in_map),
            ],
            out_specs=pl.BlockSpec((1, 8, 128), lambda c, i: (c, 0, 0)),
            scratch_shapes=[pltpu.VMEM((tr, G), jnp.float32)],
        ),
        compiler_params=pltpu.CompilerParams(
            dimension_semantics=("parallel", "arbitrary"),
            vmem_limit_bytes=40 * 1024 * 1024,
        ),
    )(pred2, label2)

    return jnp.sum(out[:, 0, 0])


def cosine_loss_ref(pred, label):
    """Pure-JAX reference matching torch.nn.CosineSimilarity(dim=2, eps=1e-6)."""
    dot = jnp.sum(pred * label, axis=2)
    n_p = jnp.sqrt(jnp.sum(pred * pred, axis=2))
    n_l = jnp.sqrt(jnp.sum(label * label, axis=2))
    cos = dot / jnp.maximum(n_p * n_l, EPS)
    return jnp.mean(cos)


if __name__ == "__main__":
    key = jax.random.PRNGKey(0)
    loss_fn = jax.jit(cosine_loss)

    def _check(shape, k):
        k1, k2 = jax.random.split(k)
        pred = jax.random.normal(k1, shape, dtype=jnp.float32)
        label = jax.random.normal(k2, shape, dtype=jnp.float32)
        got = jax.block_until_ready(loss_fn(pred, label))
        ref = cosine_loss_ref(pred, label)
        assert jnp.allclose(got, ref, atol=1e-5, rtol=1e-4), (shape, got, ref)

    keys = jax.random.split(key, 4)
    # Small shape consistent with the module (cosine axis dim=2, C=32): packed path.
    _check((2, 8, 32), keys[0])
    # Large, non-divisible row count: packed path, multi-step accumulation,
    # two-way parallel split and in-kernel ragged-tail masking.
    _check((2, 25000, 32), keys[1])
    # C that does not divide 128: general (G=1) fallback path.
    _check((3, 37, 48), keys[2])
    # Row count not divisible by the packing factor: fallback path with C=32.
    _check((1, 7, 32), keys[3])

    print("KERNEL_OK")
</pallas_src>

<mosaic_0001>
module attributes {stable_mosaic.version = 11 : i64} {
  func.func @_cosine_loss_kernel(%arg0: i32, %arg1: i32, %arg2: memref<4x128xf32, #tpu.memory_space<vmem>>, %arg3: memref<4x128xf32, #tpu.memory_space<vmem>>, %arg4: memref<1x8x128xf32, #tpu.memory_space<vmem>>, %arg5: memref<4x4xf32, #tpu.memory_space<vmem>>) attributes {dimension_semantics = [#tpu.dimension_semantics<parallel>, #tpu.dimension_semantics<arbitrary>], iteration_bounds = array<i64: 1, 1>, scalar_prefetch = 0 : i64, scratch_operands = 1 : i64, tpu.core_type = #tpu.core_type<tc>, window_params = [{transform_indices = @transform_0, window_bounds = array<i64: 4, 128>}, {transform_indices = @transform_1, window_bounds = array<i64: 4, 128>}, {transform_indices = @transform_2, window_bounds = array<i64: 1, 8, 128>}]} {
    %c0_i32 = arith.constant 0 : i32
    %0 = arith.cmpi eq, %arg1, %c0_i32 : i32
    %1 = arith.extui %0 : i1 to i32
    %c0_i32_0 = arith.constant 0 : i32
    %2 = arith.cmpi ne, %1, %c0_i32_0 : i32
    scf.if %2 {
      %cst_14 = arith.constant 0.000000e+00 : f32
      %35 = vector.broadcast %cst_14 : f32 to vector<4x4xf32>
      %c0_15 = arith.constant 0 : index
      %c0_16 = arith.constant 0 : index
      %36 = vector.load %arg5[%c0_15, %c0_16] : memref<4x4xf32, #tpu.memory_space<vmem>>, vector<4x4xf32>
      tpu.vector_store %arg5[%c0_15, %c0_16], %35 {strides = array<i32>} : memref<4x4xf32, #tpu.memory_space<vmem>>, vector<4x4xf32>,
    } else {
    }
    %c0 = arith.constant 0 : index
    %c0_1 = arith.constant 0 : index
    %3 = vector.load %arg2[%c0, %c0_1] : memref<4x128xf32, #tpu.memory_space<vmem>>, vector<4x128xf32>
    %c0_2 = arith.constant 0 : index
    %c0_3 = arith.constant 0 : index
    %4 = vector.load %arg3[%c0_2, %c0_3] : memref<4x128xf32, #tpu.memory_space<vmem>>, vector<4x128xf32>
    %5 = arith.mulf %3, %4 : vector<4x128xf32>
    %6 = arith.mulf %3, %3 : vector<4x128xf32>
    %7 = arith.mulf %4, %4 : vector<4x128xf32>
    %8 = tpu.iota {dimensions = array<i32: 0>} : vector<128x4xi32>
    %9 = tpu.iota {dimensions = array<i32: 1>} : vector<128x4xi32>
    %c32_i32 = arith.constant 32 : i32
    %10 = vector.broadcast %c32_i32 : i32 to vector<128x4xi32>
    %11 = arith.muli %9, %10 : vector<128x4xi32>
    %12 = arith.cmpi sge, %8, %11 : vector<128x4xi32>
    %c1_i32 = arith.constant 1 : i32
    %13 = vector.broadcast %c1_i32 : i32 to vector<128x4xi32>
    %14 = arith.addi %9, %13 : vector<128x4xi32>
    %c32_i32_4 = arith.constant 32 : i32
    %15 = vector.broadcast %c32_i32_4 : i32 to vector<128x4xi32>
    %16 = arith.muli %14, %15 : vector<128x4xi32>
    %17 = arith.cmpi slt, %8, %16 : vector<128x4xi32>
    %18 = arith.andi %12, %17 : vector<128x4xi1>
    %19 = arith.extui %18 : vector<128x4xi1> to vector<128x4xi32>
    %20 = arith.sitofp %19 : vector<128x4xi32> to vector<128x4xf32>
    %cst = arith.constant dense<0.000000e+00> : vector<4x4xf32>
    %21 = tpu.matmul %5, %20, %cst {dimension_numbers = #tpu.dot_dimension_numbers<[1], [0], [0], [1], [0, 0, 1, 1], [], []>, precision = #tpu.contract_precision<fp32>} : vector<4x128xf32>, vector<128x4xf32>, vector<4x4xf32> -> vector<4x4xf32>
    %cst_5 = arith.constant dense<0.000000e+00> : vector<4x4xf32>
    %22 = tpu.matmul %6, %20, %cst_5 {dimension_numbers = #tpu.dot_dimension_numbers<[1], [0], [0], [1], [0, 0, 1, 1], [], []>, precision = #tpu.contract_precision<fp32>} : vector<4x128xf32>, vector<128x4xf32>, vector<4x4xf32> -> vector<4x4xf32>
    %cst_6 = arith.constant dense<0.000000e+00> : vector<4x4xf32>
    %23 = tpu.matmul %7, %20, %cst_6 {dimension_numbers = #tpu.dot_dimension_numbers<[1], [0], [0], [1], [0, 0, 1, 1], [], []>, precision = #tpu.contract_precision<fp32>} : vector<4x128xf32>, vector<128x4xf32>, vector<4x4xf32> -> vector<4x4xf32>
    %24 = arith.mulf %22, %23 : vector<4x4xf32>
    %cst_7 = arith.constant 9.99999996E-13 : f32
    %25 = vector.broadcast %cst_7 : f32 to vector<4x4xf32>
    %26 = arith.maximumf %24, %25 : vector<4x4xf32>
    %27 = math.rsqrt %26 : vector<4x4xf32>
    %28 = arith.mulf %21, %27 : vector<4x4xf32>
    %c0_8 = arith.constant 0 : index
    %c0_9 = arith.constant 0 : index
    %29 = vector.load %arg5[%c0_8, %c0_9] : memref<4x4xf32, #tpu.memory_space<vmem>>, vector<4x4xf32>
    %30 = arith.addf %29, %28 : vector<4x4xf32>
    %c0_10 = arith.constant 0 : index
    %c0_11 = arith.constant 0 : index
    %31 = vector.load %arg5[%c0_10, %c0_11] : memref<4x4xf32, #tpu.memory_space<vmem>>, vector<4x4xf32>
    tpu.vector_store %arg5[%c0_10, %c0_11], %30 {strides = array<i32>} : memref<4x4xf32, #tpu.memory_space<vmem>>, vector<4x4xf32>,
    %c0_i32_12 = arith.constant 0 : i32
    %32 = arith.cmpi eq, %arg1, %c0_i32_12 : i32
    %33 = arith.extui %32 : i1 to i32
    %c0_i32_13 = arith.constant 0 : i32
    %34 = arith.cmpi ne, %33, %c0_i32_13 : i32
    scf.if %34 {
      %c0_14 = arith.constant 0 : index
      %c0_15 = arith.constant 0 : index
      %35 = vector.load %arg5[%c0_14, %c0_15] : memref<4x4xf32, #tpu.memory_space<vmem>>, vector<4x4xf32>
      %36 = vector.shape_cast %35 : vector<4x4xf32> to vector<1x4x4xf32>
      %cst_16 = arith.constant dense<0.000000e+00> : vector<1xf32>
      %37 = vector.multi_reduction <add>, %36, %cst_16 [1, 2] : vector<1x4x4xf32> to vector<1xf32>
      %38 = vector.shape_cast %37 : vector<1xf32> to vector<1x1x1xf32>
      %39 = vector.extract %38[0, 0, 0] : f32 from vector<1x1x1xf32>
      %cst_17 = arith.constant 6.250000e-02 : f32
      %40 = arith.mulf %39, %cst_17 : f32
      %41 = vector.broadcast %40 : f32 to vector<1x8x128xf32>
      %c0_18 = arith.constant 0 : index
      %c0_19 = arith.constant 0 : index
      %c0_20 = arith.constant 0 : index
      %42 = vector.load %arg4[%c0_18, %c0_19, %c0_20] : memref<1x8x128xf32, #tpu.memory_space<vmem>>, vector<1x8x128xf32>
      tpu.vector_store %arg4[%c0_18, %c0_19, %c0_20], %41 {strides = array<i32>} : memref<1x8x128xf32, #tpu.memory_space<vmem>>, vector<1x8x128xf32>,
    } else {
    }
    return
  }
  func.func @transform_0(%arg0: i32, %arg1: i32) -> (i32, i32) {
    %c1_i32 = arith.constant 1 : i32
    %0 = arith.muli %arg0, %c1_i32 : i32
    %1 = arith.addi %0, %arg1 : i32
    %c0_i32 = arith.constant 0 : i32
    %c0_i32_0 = arith.constant 0 : i32
    return %1, %c0_i32 : i32, i32
  }
  func.func @transform_1(%arg0: i32, %arg1: i32) -> (i32, i32) {
    %c1_i32 = arith.constant 1 : i32
    %0 = arith.muli %arg0, %c1_i32 : i32
    %1 = arith.addi %0, %arg1 : i32
    %c0_i32 = arith.constant 0 : i32
    %c0_i32_0 = arith.constant 0 : i32
    return %1, %c0_i32 : i32, i32
  }
  func.func @transform_2(%arg0: i32, %arg1: i32) -> (i32, i32, i32) {
    %c0_i32 = arith.constant 0 : i32
    %c0_i32_0 = arith.constant 0 : i32
    %c0_i32_1 = arith.constant 0 : i32
    return %arg0, %c0_i32, %c0_i32_0 : i32, i32, i32
  }
}

</mosaic_0001>

<bundles_post_ra>
// kernel: cosine_loss.1
= control target key start
LH: loop header
LB: loop body
LE: loop exit
PB: predicated region body
PF: predicated region fallthrough
CT: control target
= control target key end

     0   :  { %v56_v0 = vlaneseq  ;;  %v3687_v1 = vmov 0.0|0.0   ;;  %vm4605_vm0 = vmmov 0   ;;  %v3689_v4 = vmov 0.0   ;;  %s4602_s0 = inlined_call_operand.vmem [shape: f32[4,128], index: 0, kind: input, shape index: {}]   ;;  %s4603_s1 = inlined_call_operand.vmem [shape: f32[4,128], index: 1, kind: input, shape index: {}]   ;;  %s4604_s2 = inlined_call_operand.vmem [shape: f32[1,8,128], index: 2, kind: output, shape index: {}]  }
   0x1   :  { %3218 = vmatprep.subr.bf16.mxu1 %v3687_v1  ;;  %3290 = vmatprep.subr.bf16.mxu0 %v3687_v1  ;;  %v4620_v15 = vmov 0  ;;  %v3690_v17 = vmov 1.0|1.0   ;;  %v4626_v21 = vmov 0  ;;  %v3792_v25 = vld [vmem:[%s4602_s0] sm:$0xf] }
   0x2   :  { %v3708_v2 = vshrl.u32 %v56_v0, 7  ;;  %v74_v3 = vand.u32 127, %v56_v0  ;;  %2620 = vmatprep.mubr.msk.f32.mxu1 %vm4605_vm0, %v3689_v4  ;;  %2725 = vmatprep.mubr.msk.f32.mxu0 %vm4605_vm0, %v3689_v4  ;;  %v3797_v26 = vld [vmem:[%s4603_s1] sm:$0xf]  ;;  %v4632_v28 = vmov 0  ;;  %v4636_v33 = vmov 0 }
   0x3   :  { %v53_v32 = vmul.f32 %v3797_v26, %v3792_v25  ;;  %v4644_v42 = vmov 0 }
   0x4   :  { %v58_v5 = vadd.s32 8, %v3708_v2  ;;  %v3715_v6 = vmul.u32 32, %v74_v3  ;;  %v92_v7 = vadd.s32 1, %v74_v3  ;;  %v59_v8 = vadd.s32 16, %v3708_v2 }
   0x5   :  { %v60_v10 = vadd.s32 24, %v3708_v2  ;;  %v61_v11 = vadd.s32 32, %v3708_v2  ;;  %v62_v13 = vadd.s32 40, %v3708_v2  ;;  %v63_v16 = vadd.s32 48, %v3708_v2 }
   0x6   :  { %vm76_vm1 = vcmp.ge.s32.totalorder %v3708_v2, %v3715_v6  ;;  %v3720_v9 = vmul.u32 32, %v92_v7  ;;  %vm77_vm2 = vcmp.ge.s32.totalorder %v58_v5, %v3715_v6  ;;  %vm78_vm6 = vcmp.ge.s32.totalorder %v59_v8, %v3715_v6 }
   0x7   :  { %vm79_vm9 = vcmp.ge.s32.totalorder %v60_v10, %v3715_v6  ;;  %vm80_vm13 = vcmp.ge.s32.totalorder %v61_v11, %v3715_v6  ;;  %v64_v19 = vadd.s32 56, %v3708_v2  ;;  %v65_v22 = vadd.s32 64, %v3708_v2 }
   0x8   :  { %vm94_vm3 = vcmp.lt.s32.totalorder %v3708_v2, %v3720_v9  ;;  %vm95_vm4 = vcmp.lt.s32.totalorder %v58_v5, %v3720_v9  ;;  %vm96_vm7 = vcmp.lt.s32.totalorder %v59_v8, %v3720_v9  ;;  %vm97_vm10 = vcmp.lt.s32.totalorder %v60_v10, %v3720_v9 }
   0x9   :  { %vm3728_vm5 = vmand %vm76_vm1, %vm94_vm3  ;;  %vm98_vm14 = vcmp.lt.s32.totalorder %v61_v11, %v3720_v9  ;;  %vm81_vm1 = vcmp.ge.s32.totalorder %v62_v13, %v3715_v6  ;;  %v66_v24 = vadd.s32 72, %v3708_v2  ;;  %v67_v29 = vadd.s32 80, %v3708_v2 }
   0xa   :  { %vm3735_vm8 = vmand %vm77_vm2, %vm95_vm4  ;;  %vm99_vm2 = vcmp.lt.s32.totalorder %v62_v13, %v3720_v9  ;;  %vm102_vm0 = vcmp.lt.s32.totalorder %v65_v22, %v3720_v9  ;;  %v68_v31 = vadd.s32 88, %v3708_v2  ;;  %v69_v35 = vadd.s32 96, %v3708_v2 }
   0xb   :  { %vm3745_vm11 = vmpackc.low %vm3735_vm8, %vm3728_vm5  ;;  %v2122_v37 = vsel %vm3728_vm5, 1.0, %v3689_v4  ;;  %v2123_v38 = vsel %vm3735_vm8, 1.0, %v3689_v4  ;;  %v70_v40 = vadd.s32 104, %v3708_v2  ;;  %v3873_v41 = vand.u32 4294901760, %v53_v32 }
   0xc   :  { %v4621_v15 = vsel %vm3745_vm11, 4294967295, %v4620_v15  ;;  %3220 = vmatpush3.bf16.msk.msra.mxu1 %vm3745_vm11, %v3690_v17  ;;  %3292 = vmatpush3.bf16.msk.msra.mxu0 %vm3745_vm11, %v3690_v17  ;;  %vm3756_vm12 = vmand %vm78_vm6, %vm96_vm7  ;;  %vm82_vm6 = vcmp.ge.s32.totalorder %v63_v16, %v3715_v6  ;;  %vm100_vm7 = vcmp.lt.s32.totalorder %v63_v16, %v3720_v9  ;;  %vm85_vm11 = vcmp.ge.s32.totalorder %v66_v24, %v3715_v6 }
   0xd   :  { %3221 = vmatprep.subr.bf16.mxu1 %v3687_v1  ;;  %3293 = vmatprep.subr.bf16.mxu0 %v3687_v1  ;;  %vm3767_vm15 = vmand %vm79_vm9, %vm97_vm10  ;;  %vm83_vm10 = vcmp.ge.s32.totalorder %v64_v19, %v3715_v6  ;;  %v2124_v43 = vsel %vm3756_vm12, 1.0, %v3689_v4  ;;  %v3896_v45 = vsub.f32 %v2122_v37, %v2122_v37  ;;  %v3898_v46 = vsub.f32 %v2123_v38, %v2123_v38 }
   0xe   :  { %vm3777_vm3 = vmpackc.low %vm3767_vm15, %vm3756_vm12  ;;  %v2125_v47 = vsel %vm3767_vm15, 1.0, %v3689_v4  ;;  %vm88_vm12 = vcmp.ge.s32.totalorder %v69_v35, %v3715_v6  ;;  %v71_v49 = vadd.s32 112, %v3708_v2  ;;  %v72_v50 = vadd.s32 120, %v3708_v2 }
   0xf   :  { %v4627_v21 = vsel %vm3777_vm3, 4294967295, %v4626_v21  ;;  %vm3782_vm4 = vmand %vm80_vm13, %vm98_vm14  ;;  %vm101_vm13 = vcmp.lt.s32.totalorder %v64_v19, %v3720_v9  ;;  %vm107_vm15 = vcmp.lt.s32.totalorder %v70_v40, %v3720_v9  ;;  %v3916_v51 = vsub.f32 %v53_v32, %v3873_v41 }
  0x10   :  { %3223 = vmatpush3.bf16.msk.msra.mxu1 %vm3777_vm3, %v3690_v17  ;;  %3295 = vmatpush3.bf16.msk.msra.mxu0 %vm3777_vm3, %v3690_v17  ;;  %vm3805_vm9 = vmand %vm81_vm1, %vm99_vm2  ;;  %vm84_vm2 = vcmp.ge.s32.totalorder %v65_v22, %v3715_v6  ;;  %v3918_v52 = vsub.f32 %v2124_v43, %v2124_v43  ;;  %v3928_v54 = vsub.f32 %v2125_v47, %v2125_v47  ;;  %v252_v56 = vand.u32 4294901760, %v3896_v45 }
  0x11   :  { %3224 = vmatprep.subr.bf16.mxu1 %v3687_v1  ;;  %3296 = vmatprep.subr.bf16.mxu0 %v3687_v1  ;;  %vm3817_vm14 = vmpackc.low %vm3805_vm9, %vm3782_vm4  ;;  %v259_v57 = vand.u32 4294901760, %v3898_v46  ;;  %v2126_v58 = vsel %vm3782_vm4, 1.0, %v3689_v4  ;;  %v2127_v60 = vsel %vm3805_vm9, 1.0, %v3689_v4  ;;  %v241_v61 = vand.u32 4294901760, %v3916_v51 }
  0x12   :  { %v4633_v28 = vsel %vm3817_vm14, 4294967295, %v4632_v28  ;;  %vm3822_vm1 = vmand %vm82_vm6, %vm100_vm7  ;;  %vm103_vm6 = vcmp.lt.s32.totalorder %v66_v24, %v3720_v9  ;;  %v266_v62 = vand.u32 4294901760, %v3918_v52  ;;  %vm109_vm4 = vcmp.lt.s32.totalorder %v72_v50, %v3720_v9 }
  0x13   :  { %vm3831_vm3 = vmand %vm83_vm10, %vm101_vm13  ;;  %vm86_vm13 = vcmp.ge.s32.totalorder %v67_v29, %v3715_v6  ;;  %v273_v63 = vand.u32 4294901760, %v3928_v54  ;;  %v3961_v0 = vsub.f32 %v2126_v58, %v2126_v58  ;;  %v2128_v2 = vsel %vm3822_vm1, 1.0, %v3689_v4 }
  0x14   :  { %v4637_v33 = vsel %vm3831_vm3, 4294967295, %v4636_v33  ;;  %3226 = vmatpush3.bf16.msk.msra.mxu1 %vm3817_vm14, %v3690_v17  ;;  %3298 = vmatpush3.bf16.msk.msra.mxu0 %vm3817_vm14, %v3690_v17  ;;  %vm3847_vm7 = vmpackc.low %vm3831_vm3, %vm3822_vm1  ;;  %vm104_vm14 = vcmp.lt.s32.totalorder %v67_v29, %v3720_v9  ;;  %v253_v5 = vsub.f32 %v3896_v45, %v252_v56  ;;  %v260_v7 = vsub.f32 %v3898_v46, %v259_v57 }
  0x15   :  { %3227 = vmatprep.subr.bf16.mxu1 %v3687_v1  ;;  %3299 = vmatprep.subr.bf16.mxu0 %v3687_v1  ;;  %vm3854_vm10 = vmand %vm84_vm2, %vm102_vm0  ;;  %vm87_vm0 = vcmp.ge.s32.totalorder %v68_v31, %v3715_v6  ;;  %vm105_vm2 = vcmp.lt.s32.totalorder %v68_v31, %v3720_v9  ;;  %v3982_v8 = vsub.f32 %v2127_v60, %v2127_v60  ;;  %v280_v18 = vand.u32 4294901760, %v3961_v0 }
  0x16   :  { %vm3866_vm3 = vmand %vm85_vm11, %vm103_vm6  ;;  %vm89_vm6 = vcmp.ge.s32.totalorder %v70_v40, %v3715_v6  ;;  %vm4658_vm1 = vnez %v4637_v33  ;;  %v242_v13 = vsub.f32 %v3916_v51, %v241_v61  ;;  %v267_v14 = vsub.f32 %v3918_v52, %v266_v62 }
  0x17   :  { %vm3879_vm5 = vmpackc.low %vm3866_vm3, %vm3854_vm10  ;;  %v2129_v10 = vsel %vm4658_vm1, 1.0, %v3689_v4  ;;  %v4005_v16 = vsub.f32 %v2128_v2, %v2128_v2  ;;  %v254_v20 = vand.u32 4294901760, %v253_v5  ;;  %v261_v22 = vand.u32 4294901760, %v260_v7 }
  0x18   :  { %v4645_v42 = vsel %vm3879_vm5, 4294967295, %v4644_v42  ;;  %3229 = vmatpush3.bf16.msk.msra.mxu1 %vm3847_vm7, %v3690_v17  ;;  %3301 = vmatpush3.bf16.msk.msra.mxu0 %vm3847_vm7, %v3690_v17  ;;  %vm3892_vm8 = vmand %vm86_vm13, %vm104_vm14  ;;  %vm106_vm14 = vcmp.lt.s32.totalorder %v69_v35, %v3720_v9  ;;  %v4009_v19 = vsub.f32 %v2129_v10, %v2129_v10  ;;  %v287_v23 = vand.u32 4294901760, %v3982_v8 }
  0x19   :  { %3230 = vmatprep.subr.bf16.mxu1 %v3687_v1  ;;  %3302 = vmatprep.subr.bf16.mxu0 %v3687_v1  ;;  %vm3905_vm11 = vmand %vm87_vm0, %vm105_vm2  ;;  %v2131_v24 = vsel %vm3866_vm3, 1.0, %v3689_v4  ;;  %v4034_v29 = vpack.c.bf16 %v259_v57, %v252_v56  ;;  %v243_v30 = vand.u32 4294901760, %v242_v13  ;;  %v268_v31 = vand.u32 4294901760, %v267_v14 }
  0x1a   :  { %vm3924_vm13 = vmpackc.low %vm3905_vm11, %vm3892_vm8  ;;  %v294_v32 = vand.u32 4294901760, %v4005_v16  ;;  %v281_v36 = vsub.f32 %v3961_v0, %v280_v18  ;;  %v301_v37 = vand.u32 4294901760, %v4009_v19  ;;  %v4041_v38 = vsub.f32 %v2131_v24, %v2131_v24 }
  0x1b   :  { %vm3936_vm0 = vmand %vm88_vm12, %vm106_vm14  ;;  %vm90_vm12 = vcmp.ge.s32.totalorder %v71_v49, %v3715_v6  ;;  %vm91_vm14 = vcmp.ge.s32.totalorder %v72_v50, %v3715_v6  ;;  %v2130_v6 = vsel %vm3854_vm10, 1.0, %v3689_v4  ;;  %v4049_v39 = vpack.c.bf16 %v261_v22, %v254_v20 }
  0x1c   :  { %3232 = vmatpush3.bf16.msk.msra.mxu1 %vm3879_vm5, %v3690_v17  ;;  %3304 = vmatpush3.bf16.msk.msra.mxu0 %vm3879_vm5, %v3690_v17  ;;  %vm3947_vm2 = vmand %vm89_vm6, %vm107_vm15  ;;  %vm108_vm5 = vcmp.lt.s32.totalorder %v71_v49, %v3720_v9  ;;  %v274_v9 = vsub.f32 %v3928_v54, %v273_v63  ;;  %v4037_v33 = vsub.f32 %v2130_v6, %v2130_v6  ;;  %v2132_v43 = vsel %vm3892_vm8, 1.0, %v3689_v4 }
  0x1d   :  { %3233 = vmatprep.subr.bf16.mxu1 %v3687_v1  ;;  %3305 = vmatprep.subr.bf16.mxu0 %v3687_v1  ;;  %vm3976_vm9 = vmpackc.low %vm3947_vm2, %vm3936_vm0  ;;  %v288_v40 = vsub.f32 %v3982_v8, %v287_v23  ;;  %v2133_v47 = vsel %vm3905_vm11, 1.0, %v3689_v4  ;;  %v295_v49 = vsub.f32 %v4005_v16, %v294_v32  ;;  %v302_v56 = vsub.f32 %v4009_v19, %v301_v37 }
  0x1e   :  { %vm3993_vm6 = vmand %vm90_vm12, %vm108_vm5  ;;  %v275_v35 = vand.u32 4294901760, %v274_v9  ;;  %v308_v50 = vand.u32 4294901760, %v4037_v33  ;;  %v315_v57 = vand.u32 4294901760, %v4041_v38  ;;  %v4064_v44 = vsub.f32 %v2132_v43, %v2132_v43 }
  0x1f   :  { %vm3999_vm15 = vmand %vm91_vm14, %vm109_vm4  ;;  %v4066_v58 = vsub.f32 %v2133_v47, %v2133_v47  ;;  %v4072_v60 = vpack.c.bf16 %v273_v63, %v266_v62  ;;  %v282_v2 = vand.u32 4294901760, %v281_v36  ;;  %v289_v5 = vand.u32 4294901760, %v288_v40 }
  0x20   :  { %3235 = vmatpush3.bf16.msk.msra.mxu1 %vm3924_vm13, %v3690_v17  ;;  %3307 = vmatpush3.bf16.msk.msra.mxu0 %vm3924_vm13, %v3690_v17  ;;  %vm4030_vm10 = vmpackc.low %vm3999_vm15, %vm3993_vm6  ;;  %v4070_v48 = vpack.c.bf16 %v275_v35, %v268_v31  ;;  %v2135_v7 = vsel %vm3947_vm2, 1.0, %v3689_v4  ;;  %v4082_v10 = vpack.c.bf16 %v287_v23, %v280_v18  ;;  %v296_v13 = vand.u32 4294901760, %v295_v49 }
  0x21   :  { %3236 = vmatprep.subr.bf16.mxu1 %v3687_v1  ;;  %3308 = vmatprep.subr.bf16.mxu0 %v3687_v1  ;;  %v309_v62 = vsub.f32 %v4037_v33, %v308_v50  ;;  %vm4665_vm3 = vmmov 0   ;;  %v303_v63 = vand.u32 4294901760, %v302_v56  ;;  %v316_v14 = vsub.f32 %v4041_v38, %v315_v57 }
  0x22   :  { %v322_v55 = vand.u32 4294901760, %v4064_v44  ;;  %v329_v9 = vand.u32 4294901760, %v4066_v58  ;;  %v4094_v59 = vpack.c.bf16 %v289_v5, %v282_v2  ;;  %v4098_v6 = vsub.f32 %v2135_v7, %v2135_v7 }
  0x23   :  { %v2136_v20 = vsel %vm3993_vm6, 1.0, %v3689_v4  ;;  %v2137_v22 = vsel %vm3999_vm15, 1.0, %v3689_v4  ;;  %v4108_v23 = vpack.c.bf16 %v301_v37, %v294_v32  ;;  %v310_v24 = vand.u32 4294901760, %v309_v62 }
  0x24   :  { %3238 = vmatpush3.bf16.msk.msra.mxu1 %vm3976_vm9, %v3690_v17  ;;  %3310 = vmatpush3.bf16.msk.msra.mxu0 %vm3976_vm9, %v3690_v17  ;;  %v317_v31 = vand.u32 4294901760, %v316_v14  ;;  %v323_v35 = vsub.f32 %v4064_v44, %v322_v55  ;;  %v330_v36 = vsub.f32 %v4066_v58, %v329_v9  ;;  %v343_v40 = vand.u32 4294901760, %v4098_v6 }
  0x25   :  { %3239 = vmatprep.subr.bf16.mxu1 %v3687_v1  ;;  %3311 = vmatprep.subr.bf16.mxu0 %v3687_v1  ;;  %v4118_v12 = vsub.f32 %v2136_v20, %v2136_v20  ;;  %v4120_v32 = vsub.f32 %v2137_v22, %v2137_v22  ;;  %v4126_v43 = vpack.c.bf16 %v315_v57, %v308_v50 }
  0x26   :  { %v4124_v37 = vpack.c.bf16 %v317_v31, %v310_v24  ;;  %v324_v47 = vand.u32 4294901760, %v323_v35  ;;  %v331_v49 = vand.u32 4294901760, %v330_v36  ;;  %v344_v2 = vsub.f32 %v4098_v6, %v343_v40 }
  0x27   :  { %v350_v5 = vand.u32 4294901760, %v4118_v12  ;;  %v4138_v57 = vpack.c.bf16 %v329_v9, %v322_v55  ;;  %v4166_v31 = vpack.c.bf16 %v3898_v46, %v3896_v45  ;;  %vm4666_vm5 = vnez %v4621_v15 }
  0x28   :  { %3241 = vmatpush3.bf16.msk.msra.mxu1 %vm4030_vm10, %v3690_v17  ;;  %3313 = vmatpush3.bf16.msk.msra.mxu0 %vm4030_vm10, %v3690_v17  ;;  %v4136_v50 = vpack.c.bf16 %v331_v49, %v324_v47  ;;  %v4178_v35 = vpack.c.bf16 %v3928_v54, %v3918_v52  ;;  %vm4667_vm8 = vnez %v4627_v21  ;;  %v4192_v45 = vpack.c.bf16 %v3982_v8, %v3961_v0 }
  0x29   :  { %3242 = vmatprep.subr.bf16.mxu1 %v3687_v1  ;;  %3314 = vmatprep.subr.bf16.mxu0 %v3687_v1  ;;  %v351_v62 = vsub.f32 %v4118_v12, %v350_v5  ;;  %vm4668_vm11 = vnez %v4633_v28  ;;  %v4202_v46 = vpack.c.bf16 %v4009_v19, %v4005_v16  ;;  %v4212_v52 = vpack.c.bf16 %v4041_v38, %v4037_v33 }
  0x2a   :  { %v4222_v54 = vpack.c.bf16 %v4066_v58, %v4064_v44  ;;  %v4242_v8 = vpack.c.bf16 %v4120_v32, %v4118_v12 }
  0x2b   :  { %2621 = vmatmul.mubr.f32.vlgmr.msra.gmra.mrb[0].mxu1 %v243_v30  ;;  %2726 = vmatmul.mubr.f32.vlgmr.msra.gmra.mrb[0].mxu0 %v241_v61  ;;  %v2134_v61 = vsel %vm3936_vm0, 1.0, %v3689_v4  ;;  %v4110_v30 = vpack.c.bf16 %v303_v63, %v296_v13  ;;  %v345_v13 = vand.u32 4294901760, %v344_v2  ;;  %v352_v9 = vand.u32 4294901760, %v351_v62 }
  0x2c   :  { %3244 = vmatpush3.bf16.msra.mxu1 %v4049_v39  ;;  %3316 = vmatpush3.bf16.msra.mxu0 %v4034_v29  ;;  %v4096_v18 = vsub.f32 %v2134_v61, %v2134_v61  ;;  %v357_v61 = vand.u32 4294901760, %v4120_v32  ;;  %vm4669_vm0 = vnez %v4645_v42 }
  0x2d   :  { %3245 = vmatprep.subr.bf16.mxu1 %v3687_v1  ;;  %3317 = vmatprep.subr.bf16.mxu0 %v3687_v1 }
  0x2e   :  { %2655 = vmatprep.mubr.msk.f32.mxu1 %vm4665_vm3, %v3689_v4  ;;  %2760 = vmatprep.mubr.msk.f32.mxu0 %vm4665_vm3, %v3689_v4  ;;  %v336_v11 = vand.u32 4294901760, %v4096_v18  ;;  %v358_v63 = vsub.f32 %v4120_v32, %v357_v61  ;;  %v4158_v24 = vpack.c.bf16 %v357_v61, %v350_v5  ;;  %v4232_v0 = vpack.c.bf16 %v4098_v6, %v4096_v18 }
  0x30   :  { %3247 = vmatpush3.bf16.msra.mxu1 %v4070_v48  ;;  %3319 = vmatpush3.bf16.msra.mxu0 %v4072_v60  ;;  %v337_v56 = vsub.f32 %v4096_v18, %v336_v11  ;;  %v4150_v55 = vpack.c.bf16 %v343_v40, %v336_v11  ;;  %v359_v20 = vand.u32 4294901760, %v358_v63 }
  0x31   :  { %3248 = vmatprep.subr.bf16.mxu1 %v3687_v1  ;;  %3320 = vmatprep.subr.bf16.mxu0 %v3687_v1 }
  0x32   :  { %v338_v7 = vand.u32 4294901760, %v337_v56  ;;  %v4156_v22 = vpack.c.bf16 %v359_v20, %v352_v9 }
  0x34   :  { %3250 = vmatpush3.bf16.msra.mxu1 %v4094_v59  ;;  %3322 = vmatpush3.bf16.msra.mxu0 %v4082_v10  ;;  %v4148_v14 = vpack.c.bf16 %v345_v13, %v338_v7 }
  0x35   :  { %3251 = vmatprep.subr.bf16.mxu1 %v3687_v1  ;;  %3323 = vmatprep.subr.bf16.mxu0 %v3687_v1 }
  0x38   :  { %3253 = vmatpush3.bf16.msra.mxu1 %v4110_v30  ;;  %3325 = vmatpush3.bf16.msra.mxu0 %v4108_v23 }
  0x39   :  { %3254 = vmatprep.subr.bf16.mxu1 %v3687_v1  ;;  %3326 = vmatprep.subr.bf16.mxu0 %v3687_v1 }
  0x3c   :  { %3256 = vmatpush3.bf16.msra.mxu1 %v4124_v37  ;;  %3328 = vmatpush3.bf16.msra.mxu0 %v4126_v43 }
  0x3d   :  { %3257 = vmatprep.subr.bf16.mxu1 %v3687_v1  ;;  %3329 = vmatprep.subr.bf16.mxu0 %v3687_v1 }
  0x40   :  { %3259 = vmatpush3.bf16.msra.mxu1 %v4136_v50  ;;  %3331 = vmatpush3.bf16.msra.mxu0 %v4138_v57 }
  0x41   :  { %3260 = vmatprep.subr.bf16.mxu1 %v3687_v1  ;;  %3332 = vmatprep.subr.bf16.mxu0 %v3687_v1 }
  0x44   :  { %3262 = vmatpush3.bf16.msra.mxu1 %v4148_v14  ;;  %3334 = vmatpush3.bf16.msra.mxu0 %v4150_v55 }
  0x45   :  { %3263 = vmatprep.subr.bf16.mxu1 %v3687_v1  ;;  %3335 = vmatprep.subr.bf16.mxu0 %v3687_v1 }
  0x48   :  { %3265 = vmatpush3.bf16.msra.mxu1 %v4156_v22  ;;  %3337 = vmatpush3.bf16.msra.mxu0 %v4158_v24 }
  0x49   :  { %3266 = vmatprep.subr.bf16.mxu1 %v3687_v1  ;;  %3338 = vmatprep.subr.bf16.mxu0 %v3687_v1 }
  0x4b   :  { %2656 = vmatmul.mubr.f32.vlgmr.msra.gmra.mrb[0].mxu1 %v3873_v41  ;;  %2761 = vmatmul.mubr.f32.vlgmr.msra.gmra.mrb[0].mxu0 %v3873_v41 }
  0x4c   :  { %3268 = vmatpush3.bf16.msra.mxu1 %v4166_v31  ;;  %3340 = vmatpush3.bf16.msk.msra.mxu0 %vm4666_vm5, %v3690_v17 }
  0x4d   :  { %3269 = vmatprep.subr.bf16.mxu1 %v3687_v1  ;;  %3341 = vmatprep.subr.bf16.mxu0 %v3687_v1 }
  0x4e   :  { %2690 = vmatprep.mubr.msk.f32.mxu1 %vm4665_vm3, %v3689_v4  ;;  %2795 = vmatprep.mubr.msk.f32.mxu0 %vm4665_vm3, %v3689_v4 }
  0x50   :  { %3271 = vmatpush3.bf16.msra.mxu1 %v4178_v35  ;;  %3343 = vmatpush3.bf16.msk.msra.mxu0 %vm4667_vm8, %v3690_v17 }
  0x51   :  { %3272 = vmatprep.subr.bf16.mxu1 %v3687_v1  ;;  %3344 = vmatprep.subr.bf16.mxu0 %v3687_v1 }
  0x54   :  { %3274 = vmatpush3.bf16.msra.mxu1 %v4192_v45  ;;  %3346 = vmatpush3.bf16.msk.msra.mxu0 %vm4668_vm11, %v3690_v17 }
  0x55   :  { %3275 = vmatprep.subr.bf16.mxu1 %v3687_v1  ;;  %3347 = vmatprep.subr.bf16.mxu0 %v3687_v1 }
  0x58   :  { %3277 = vmatpush3.bf16.msra.mxu1 %v4202_v46  ;;  %3349 = vmatpush3.bf16.msk.msra.mxu0 %vm3847_vm7, %v3690_v17 }
  0x59   :  { %3278 = vmatprep.subr.bf16.mxu1 %v3687_v1  ;;  %3350 = vmatprep.subr.bf16.mxu0 %v3687_v1 }
  0x5c   :  { %3280 = vmatpush3.bf16.msra.mxu1 %v4212_v52  ;;  %3352 = vmatpush3.bf16.msk.msra.mxu0 %vm4669_vm0, %v3690_v17 }
  0x5d   :  { %3281 = vmatprep.subr.bf16.mxu1 %v3687_v1  ;;  %3353 = vmatprep.subr.bf16.mxu0 %v3687_v1 }
  0x60   :  { %3283 = vmatpush3.bf16.msra.mxu1 %v4222_v54  ;;  %3355 = vmatpush3.bf16.msk.msra.mxu0 %vm3924_vm13, %v3690_v17 }
  0x61   :  { %3284 = vmatprep.subr.bf16.mxu1 %v3687_v1  ;;  %3356 = vmatprep.subr.bf16.mxu0 %v3687_v1 }
  0x64   :  { %3286 = vmatpush3.bf16.msra.mxu1 %v4232_v0  ;;  %3358 = vmatpush3.bf16.msk.msra.mxu0 %vm3976_vm9, %v3690_v17 }
  0x65   :  { %3287 = vmatprep.subr.bf16.mxu1 %v3687_v1  ;;  %3359 = vmatprep.subr.bf16.mxu0 %v3687_v1 }
  0x68   :  { %3289 = vmatpush3.bf16.msra.mxu1 %v4242_v8  ;;  %3361 = vmatpush3.bf16.msk.msra.mxu0 %vm4030_vm10, %v3690_v17 }
  0x69   :  { %3362 = vmatprep.subr.bf16.mxu1 %v3687_v1  ;;  %3506 = vmatprep.subr.bf16.mxu0 %v3687_v1 }
  0x6b   :  { %2691 = vmatmul.mubr.f32.vlgmr.msra.gmra.mrb[0].mxu1 %v3916_v51  ;;  %2796 = vmatmul.mubr.f32.vlgmr.msra.gmra.mrb[0].mxu0 %v3873_v41  ;;  %v54_v41 = vmul.f32 %v3792_v25, %v3792_v25  ;;  %v55_v51 = vmul.f32 %v3797_v26, %v3797_v26 }
  0x6c   :  { %3364 = vmatpush3.bf16.msk.msra.mxu1 %vm4666_vm5, %v3690_v17  ;;  %3508 = vmatpush3.bf16.msk.msra.mxu0 %vm4666_vm5, %v3690_v17 }
  0x6d   :  { %3365 = vmatprep.subr.bf16.mxu1 %v3687_v1  ;;  %3509 = vmatprep.subr.bf16.mxu0 %v3687_v1  ;;  %v4286_v16 = vand.u32 4294901760, %v54_v41  ;;  %v4288_v19 = vand.u32 4294901760, %v55_v51 }
  0x6e   :  { %2830 = vmatprep.mubr.msk.f32.mxu1 %vm4665_vm3, %v3689_v4  ;;  %3040 = vmatprep.mubr.msk.f32.mxu0 %vm4665_vm3, %v3689_v4 }
  0x6f   :  { %v4299_v25 = vsub.f32 %v54_v41, %v4286_v16  ;;  %v4302_v26 = vsub.f32 %v55_v51, %v4288_v19 }
  0x70   :  { %3367 = vmatpush3.bf16.msk.msra.mxu1 %vm4667_vm8, %v3690_v17  ;;  %3511 = vmatpush3.bf16.msk.msra.mxu0 %vm4667_vm8, %v3690_v17 }
  0x71   :  { %3368 = vmatprep.subr.bf16.mxu1 %v3687_v1  ;;  %3512 = vmatprep.subr.bf16.mxu0 %v3687_v1  ;;  %v882_v33 = vand.u32 4294901760, %v4299_v25  ;;  %v1523_v38 = vand.u32 4294901760, %v4302_v26 }
  0x73   :  { %v883_v44 = vsub.f32 %v4299_v25, %v882_v33  ;;  %v1524_v58 = vsub.f32 %v4302_v26, %v1523_v38 }
  0x74   :  { %3370 = vmatpush3.bf16.msk.msra.mxu1 %vm4668_vm11, %v3690_v17  ;;  %3514 = vmatpush3.bf16.msk.msra.mxu0 %vm4668_vm11, %v3690_v17 }
  0x75   :  { %3371 = vmatprep.subr.bf16.mxu1 %v3687_v1  ;;  %3515 = vmatprep.subr.bf16.mxu0 %v3687_v1  ;;  %v884_v18 = vand.u32 4294901760, %v883_v44  ;;  %v1525_v6 = vand.u32 4294901760, %v1524_v58 }
  0x78   :  { %3373 = vmatpush3.bf16.msk.msra.mxu1 %vm3847_vm7, %v3690_v17  ;;  %3517 = vmatpush3.bf16.msk.msra.mxu0 %vm3847_vm7, %v3690_v17 }
  0x79   :  { %3374 = vmatprep.subr.bf16.mxu1 %v3687_v1  ;;  %3518 = vmatprep.subr.bf16.mxu0 %v3687_v1 }
  0x7c   :  { %3376 = vmatpush3.bf16.msk.msra.mxu1 %vm4669_vm0, %v3690_v17  ;;  %3520 = vmatpush3.bf16.msk.msra.mxu0 %vm4669_vm0, %v3690_v17 }
  0x7d   :  { %3377 = vmatprep.subr.bf16.mxu1 %v3687_v1  ;;  %3521 = vmatprep.subr.bf16.mxu0 %v3687_v1 }
  0x80   :  { %3379 = vmatpush3.bf16.msk.msra.mxu1 %vm3924_vm13, %v3690_v17  ;;  %3523 = vmatpush3.bf16.msk.msra.mxu0 %vm3924_vm13, %v3690_v17 }
  0x81   :  { %3380 = vmatprep.subr.bf16.mxu1 %v3687_v1  ;;  %3524 = vmatprep.subr.bf16.mxu0 %v3687_v1 }
  0x84   :  { %3382 = vmatpush3.bf16.msk.msra.mxu1 %vm3976_vm9, %v3690_v17  ;;  %3526 = vmatpush3.bf16.msk.msra.mxu0 %vm3976_vm9, %v3690_v17 }
  0x85   :  { %3383 = vmatprep.subr.bf16.mxu1 %v3687_v1  ;;  %3527 = vmatprep.subr.bf16.mxu0 %v3687_v1 }
  0x88   :  { %3385 = vmatpush3.bf16.msk.msra.mxu1 %vm4030_vm10, %v3690_v17  ;;  %3529 = vmatpush3.bf16.msk.msra.mxu0 %vm4030_vm10, %v3690_v17 }
  0x89   :  { %3386 = vmatprep.subr.bf16.mxu1 %v3687_v1  ;;  %3530 = vmatprep.subr.bf16.mxu0 %v3687_v1 }
  0x8b   :  { %2831 = vmatmul.mubr.f32.vlgmr.msra.gmra.mrb[2].mxu1 %v884_v18  ;;  %3041 = vmatmul.mubr.f32.vlgmr.msra.gmra.mrb[2].mxu0 %v1525_v6 }
  0x8c   :  { %3388 = vmatpush3.bf16.msra.mxu1 %v4049_v39  ;;  %3532 = vmatpush3.bf16.msra.mxu0 %v4049_v39 }
  0x8d   :  { %3389 = vmatprep.subr.bf16.mxu1 %v3687_v1  ;;  %3533 = vmatprep.subr.bf16.mxu0 %v3687_v1 }
  0x8e   :  { %2865 = vmatprep.mubr.msk.f32.mxu1 %vm4665_vm3, %v3689_v4  ;;  %3075 = vmatprep.mubr.msk.f32.mxu0 %vm4665_vm3, %v3689_v4 }
  0x90   :  { %3391 = vmatpush3.bf16.msra.mxu1 %v4070_v48  ;;  %3535 = vmatpush3.bf16.msra.mxu0 %v4070_v48 }
  0x91   :  { %3392 = vmatprep.subr.bf16.mxu1 %v3687_v1  ;;  %3536 = vmatprep.subr.bf16.mxu0 %v3687_v1 }
  0x94   :  { %3394 = vmatpush3.bf16.msra.mxu1 %v4094_v59  ;;  %3538 = vmatpush3.bf16.msra.mxu0 %v4094_v59 }
  0x95   :  { %3395 = vmatprep.subr.bf16.mxu1 %v3687_v1  ;;  %3539 = vmatprep.subr.bf16.mxu0 %v3687_v1 }
  0x98   :  { %3397 = vmatpush3.bf16.msra.mxu1 %v4110_v30  ;;  %3541 = vmatpush3.bf16.msra.mxu0 %v4110_v30 }
  0x99   :  { %3398 = vmatprep.subr.bf16.mxu1 %v3687_v1  ;;  %3542 = vmatprep.subr.bf16.mxu0 %v3687_v1 }
  0x9c   :  { %3400 = vmatpush3.bf16.msra.mxu1 %v4124_v37  ;;  %3544 = vmatpush3.bf16.msra.mxu0 %v4124_v37 }
  0x9d   :  { %3401 = vmatprep.subr.bf16.mxu1 %v3687_v1  ;;  %3545 = vmatprep.subr.bf16.mxu0 %v3687_v1 }
  0xa0   :  { %3403 = vmatpush3.bf16.msra.mxu1 %v4136_v50  ;;  %3547 = vmatpush3.bf16.msra.mxu0 %v4136_v50 }
  0xa1   :  { %3404 = vmatprep.subr.bf16.mxu1 %v3687_v1  ;;  %3548 = vmatprep.subr.bf16.mxu0 %v3687_v1 }
  0xa4   :  { %3406 = vmatpush3.bf16.msra.mxu1 %v4148_v14  ;;  %3550 = vmatpush3.bf16.msra.mxu0 %v4148_v14 }
  0xa5   :  { %3407 = vmatprep.subr.bf16.mxu1 %v3687_v1  ;;  %3551 = vmatprep.subr.bf16.mxu0 %v3687_v1 }
  0xa8   :  { %3409 = vmatpush3.bf16.msra.mxu1 %v4156_v22  ;;  %3553 = vmatpush3.bf16.msra.mxu0 %v4156_v22 }
  0xa9   :  { %3410 = vmatprep.subr.bf16.mxu1 %v3687_v1  ;;  %3554 = vmatprep.subr.bf16.mxu0 %v3687_v1 }
  0xab   :  { %2866 = vmatmul.mubr.f32.vlgmr.msra.gmra.mrb[2].mxu1 %v4286_v16  ;;  %3076 = vmatmul.mubr.f32.vlgmr.msra.gmra.mrb[2].mxu0 %v4288_v19 }
  0xac   :  { %3412 = vmatpush3.bf16.msra.mxu1 %v4166_v31  ;;  %3556 = vmatpush3.bf16.msra.mxu0 %v4166_v31 }
  0xad   :  { %3413 = vmatprep.subr.bf16.mxu1 %v3687_v1  ;;  %3557 = vmatprep.subr.bf16.mxu0 %v3687_v1 }
  0xae   :  { %2900 = vmatprep.mubr.msk.f32.mxu1 %vm4665_vm3, %v3689_v4  ;;  %3110 = vmatprep.mubr.msk.f32.mxu0 %vm4665_vm3, %v3689_v4 }
  0xb0   :  { %3415 = vmatpush3.bf16.msra.mxu1 %v4178_v35  ;;  %3559 = vmatpush3.bf16.msra.mxu0 %v4178_v35 }
  0xb1   :  { %3416 = vmatprep.subr.bf16.mxu1 %v3687_v1  ;;  %3560 = vmatprep.subr.bf16.mxu0 %v3687_v1 }
  0xb4   :  { %3418 = vmatpush3.bf16.msra.mxu1 %v4192_v45  ;;  %3562 = vmatpush3.bf16.msra.mxu0 %v4192_v45 }
  0xb5   :  { %3419 = vmatprep.subr.bf16.mxu1 %v3687_v1  ;;  %3563 = vmatprep.subr.bf16.mxu0 %v3687_v1 }
  0xb8   :  { %3421 = vmatpush3.bf16.msra.mxu1 %v4202_v46  ;;  %3565 = vmatpush3.bf16.msra.mxu0 %v4202_v46 }
  0xb9   :  { %3422 = vmatprep.subr.bf16.mxu1 %v3687_v1  ;;  %3566 = vmatprep.subr.bf16.mxu0 %v3687_v1 }
  0xbc   :  { %3424 = vmatpush3.bf16.msra.mxu1 %v4212_v52  ;;  %3568 = vmatpush3.bf16.msra.mxu0 %v4212_v52 }
  0xbd   :  { %3425 = vmatprep.subr.bf16.mxu1 %v3687_v1  ;;  %3569 = vmatprep.subr.bf16.mxu0 %v3687_v1 }
  0xc0   :  { %3427 = vmatpush3.bf16.msra.mxu1 %v4222_v54  ;;  %3571 = vmatpush3.bf16.msra.mxu0 %v4222_v54 }
  0xc1   :  { %3428 = vmatprep.subr.bf16.mxu1 %v3687_v1  ;;  %3572 = vmatprep.subr.bf16.mxu0 %v3687_v1 }
  0xc4   :  { %3430 = vmatpush3.bf16.msra.mxu1 %v4232_v0  ;;  %3574 = vmatpush3.bf16.msra.mxu0 %v4232_v0 }
  0xc5   :  { %3431 = vmatprep.subr.bf16.mxu1 %v3687_v1  ;;  %3575 = vmatprep.subr.bf16.mxu0 %v3687_v1 }
  0xc8   :  { %3433 = vmatpush3.bf16.msra.mxu1 %v4242_v8  ;;  %3577 = vmatpush3.bf16.msra.mxu0 %v4242_v8 }
  0xc9   :  { %3434 = vmatprep.subr.bf16.mxu1 %v3687_v1  ;;  %3578 = vmatprep.subr.bf16.mxu0 %v3687_v1 }
  0xcb   :  { %2901 = vmatmul.mubr.f32.vlgmr.msra.gmra.mrb[2].mxu1 %v4299_v25  ;;  %3111 = vmatmul.mubr.f32.vlgmr.msra.gmra.mrb[2].mxu0 %v4302_v26 }
  0xcc   :  { %3436 = vmatpush3.bf16.msk.msra.mxu1 %vm4666_vm5, %v3690_v17  ;;  %3580 = vmatpush3.bf16.msk.msra.mxu0 %vm4666_vm5, %v3690_v17 }
  0xcd   :  { %3437 = vmatprep.subr.bf16.mxu1 %v3687_v1  ;;  %3581 = vmatprep.subr.bf16.mxu0 %v3687_v1 }
  0xce   :  { %2935 = vmatprep.mubr.msk.f32.mxu1 %vm4665_vm3, %v3689_v4  ;;  %3145 = vmatprep.mubr.msk.f32.mxu0 %vm4665_vm3, %v3689_v4 }
  0xd0   :  { %3439 = vmatpush3.bf16.msk.msra.mxu1 %vm4667_vm8, %v3690_v17  ;;  %3583 = vmatpush3.bf16.msk.msra.mxu0 %vm4667_vm8, %v3690_v17 }
  0xd1   :  { %3440 = vmatprep.subr.bf16.mxu1 %v3687_v1  ;;  %3584 = vmatprep.subr.bf16.mxu0 %v3687_v1 }
  0xd4   :  { %3442 = vmatpush3.bf16.msk.msra.mxu1 %vm4668_vm11, %v3690_v17  ;;  %3586 = vmatpush3.bf16.msk.msra.mxu0 %vm4668_vm11, %v3690_v17 }
  0xd5   :  { %3443 = vmatprep.subr.bf16.mxu1 %v3687_v1  ;;  %3587 = vmatprep.subr.bf16.mxu0 %v3687_v1 }
  0xd8   :  { %3445 = vmatpush3.bf16.msk.msra.mxu1 %vm3847_vm7, %v3690_v17  ;;  %3589 = vmatpush3.bf16.msk.msra.mxu0 %vm3847_vm7, %v3690_v17 }
  0xd9   :  { %3446 = vmatprep.subr.bf16.mxu1 %v3687_v1  ;;  %3590 = vmatprep.subr.bf16.mxu0 %v3687_v1 }
  0xdc   :  { %3448 = vmatpush3.bf16.msk.msra.mxu1 %vm4669_vm0, %v3690_v17  ;;  %3592 = vmatpush3.bf16.msk.msra.mxu0 %vm4669_vm0, %v3690_v17 }
  0xdd   :  { %3449 = vmatprep.subr.bf16.mxu1 %v3687_v1  ;;  %3593 = vmatprep.subr.bf16.mxu0 %v3687_v1 }
  0xe0   :  { %3451 = vmatpush3.bf16.msk.msra.mxu1 %vm3924_vm13, %v3690_v17  ;;  %3595 = vmatpush3.bf16.msk.msra.mxu0 %vm3924_vm13, %v3690_v17 }
  0xe1   :  { %3452 = vmatprep.subr.bf16.mxu1 %v3687_v1  ;;  %3596 = vmatprep.subr.bf16.mxu0 %v3687_v1 }
  0xe4   :  { %3454 = vmatpush3.bf16.msk.msra.mxu1 %vm3976_vm9, %v3690_v17  ;;  %3598 = vmatpush3.bf16.msk.msra.mxu0 %vm3976_vm9, %v3690_v17 }
  0xe5   :  { %3455 = vmatprep.subr.bf16.mxu1 %v3687_v1  ;;  %3599 = vmatprep.subr.bf16.mxu0 %v3687_v1 }
  0xe8   :  { %3457 = vmatpush3.bf16.msk.msra.mxu1 %vm4030_vm10, %v3690_v17  ;;  %3601 = vmatpush3.bf16.msk.msra.mxu0 %vm4030_vm10, %v3690_v17 }
  0xe9   :  { %3458 = vmatprep.subr.bf16.mxu1 %v3687_v1  ;;  %3602 = vmatprep.subr.bf16.mxu0 %v3687_v1 }
  0xeb   :  { %2936 = vmatmul.mubr.f32.vlgmr.msra.gmra.mrb[2].mxu1 %v882_v33  ;;  %3146 = vmatmul.mubr.f32.vlgmr.msra.gmra.mrb[2].mxu0 %v1523_v38 }
  0xec   :  { %3460 = vmatpush3.bf16.msra.mxu1 %v4034_v29  ;;  %3604 = vmatpush3.bf16.msra.mxu0 %v4034_v29 }
  0xed   :  { %3461 = vmatprep.subr.bf16.mxu1 %v3687_v1  ;;  %3605 = vmatprep.subr.bf16.mxu0 %v3687_v1 }
  0xee   :  { %2970 = vmatprep.mubr.msk.f32.mxu1 %vm4665_vm3, %v3689_v4  ;;  %3180 = vmatprep.mubr.msk.f32.mxu0 %vm4665_vm3, %v3689_v4 }
  0xf0   :  { %3463 = vmatpush3.bf16.msra.mxu1 %v4072_v60  ;;  %3607 = vmatpush3.bf16.msra.mxu0 %v4072_v60 }
  0xf1   :  { %3464 = vmatprep.subr.bf16.mxu1 %v3687_v1  ;;  %3608 = vmatprep.subr.bf16.mxu0 %v3687_v1 }
  0xf4   :  { %3466 = vmatpush3.bf16.msra.mxu1 %v4082_v10  ;;  %3610 = vmatpush3.bf16.msra.mxu0 %v4082_v10 }
  0xf5   :  { %3467 = vmatprep.subr.bf16.mxu1 %v3687_v1  ;;  %3611 = vmatprep.subr.bf16.mxu0 %v3687_v1 }
  0xf8   :  { %3469 = vmatpush3.bf16.msra.mxu1 %v4108_v23  ;;  %3613 = vmatpush3.bf16.msra.mxu0 %v4108_v23 }
  0xf9   :  { %3470 = vmatprep.subr.bf16.mxu1 %v3687_v1  ;;  %3614 = vmatprep.subr.bf16.mxu0 %v3687_v1 }
  0xfc   :  { %3472 = vmatpush3.bf16.msra.mxu1 %v4126_v43  ;;  %3616 = vmatpush3.bf16.msra.mxu0 %v4126_v43 }
  0xfd   :  { %3473 = vmatprep.subr.bf16.mxu1 %v3687_v1  ;;  %3617 = vmatprep.subr.bf16.mxu0 %v3687_v1 }
 0x100   :  { %3475 = vmatpush3.bf16.msra.mxu1 %v4138_v57  ;;  %3619 = vmatpush3.bf16.msra.mxu0 %v4138_v57 }
 0x101   :  { %3476 = vmatprep.subr.bf16.mxu1 %v3687_v1  ;;  %3620 = vmatprep.subr.bf16.mxu0 %v3687_v1 }
 0x104   :  { %3478 = vmatpush3.bf16.msra.mxu1 %v4150_v55  ;;  %3622 = vmatpush3.bf16.msra.mxu0 %v4150_v55 }
 0x105   :  { %3479 = vmatprep.subr.bf16.mxu1 %v3687_v1  ;;  %3623 = vmatprep.subr.bf16.mxu0 %v3687_v1 }
 0x108   :  { %3481 = vmatpush3.bf16.msra.mxu1 %v4158_v24  ;;  %3625 = vmatpush3.bf16.msra.mxu0 %v4158_v24 }
 0x109   :  { %3482 = vmatprep.subr.bf16.mxu1 %v3687_v1  ;;  %3626 = vmatprep.subr.bf16.mxu0 %v3687_v1 }
 0x10b   :  { %2971 = vmatmul.mubr.f32.vlgmr.msra.gmra.mrb[2].mxu1 %v4286_v16  ;;  %3181 = vmatmul.mubr.f32.vlgmr.msra.gmra.mrb[2].mxu0 %v4288_v19 }
 0x10c   :  { %3484 = vmatpush3.bf16.msk.msra.mxu1 %vm4666_vm5, %v3690_v17  ;;  %3628 = vmatpush3.bf16.msk.msra.mxu0 %vm4666_vm5, %v3690_v17 }
 0x10d   :  { %3485 = vmatprep.subr.bf16.mxu1 %v3687_v1  ;;  %3629 = vmatprep.subr.bf16.mxu0 %v3687_v1 }
 0x10e   :  { %3005 = vmatprep.mubr.msk.f32.mxu1 %vm4665_vm3, %v3689_v4  ;;  %3215 = vmatprep.mubr.msk.f32.mxu0 %vm4665_vm3, %v3689_v4 }
 0x110   :  { %3487 = vmatpush3.bf16.msk.msra.mxu1 %vm4667_vm8, %v3690_v17  ;;  %3631 = vmatpush3.bf16.msk.msra.mxu0 %vm4667_vm8, %v3690_v17 }
 0x111   :  { %3488 = vmatprep.subr.bf16.mxu1 %v3687_v1  ;;  %3632 = vmatprep.subr.bf16.mxu0 %v3687_v1 }
 0x114   :  { %3490 = vmatpush3.bf16.msk.msra.mxu1 %vm4668_vm11, %v3690_v17  ;;  %3634 = vmatpush3.bf16.msk.msra.mxu0 %vm4668_vm11, %v3690_v17 }
 0x115   :  { %3491 = vmatprep.subr.bf16.mxu1 %v3687_v1  ;;  %3635 = vmatprep.subr.bf16.mxu0 %v3687_v1 }
 0x118   :  { %3493 = vmatpush3.bf16.msk.msra.mxu1 %vm3847_vm7, %v3690_v17  ;;  %3637 = vmatpush3.bf16.msk.msra.mxu0 %vm3847_vm7, %v3690_v17  ;;  %vm49_vm7 = vcmask 27648  }
 0x119   :  { %3494 = vmatprep.subr.bf16.mxu1 %v3687_v1  ;;  %3638 = vmatprep.subr.bf16.mxu0 %v3687_v1  ;;  %50 = vst.msk [vmem:[#allocation2] sm:$0xf] %vm49_vm7, %v3689_v4 }
 0x11c   :  { %3496 = vmatpush3.bf16.msk.msra.mxu1 %vm4669_vm0, %v3690_v17  ;;  %3640 = vmatpush3.bf16.msk.msra.mxu0 %vm4669_vm0, %v3690_v17 }
 0x11d   :  { %3497 = vmatprep.subr.bf16.mxu1 %v3687_v1  ;;  %3641 = vmatprep.subr.bf16.mxu0 %v3687_v1 }
 0x120   :  { %3499 = vmatpush3.bf16.msk.msra.mxu1 %vm3924_vm13, %v3690_v17  ;;  %3643 = vmatpush3.bf16.msk.msra.mxu0 %vm3924_vm13, %v3690_v17  ;;  %v2085_v27 = vld [vmem:[#allocation2] sm:$0xf] }
 0x121   :  { %3500 = vmatprep.subr.bf16.mxu1 %v3687_v1  ;;  %3644 = vmatprep.subr.bf16.mxu0 %v3687_v1 }
 0x124   :  { %3502 = vmatpush3.bf16.msk.msra.mxu1 %vm3976_vm9, %v3690_v17  ;;  %3646 = vmatpush3.bf16.msk.msra.mxu0 %vm3976_vm9, %v3690_v17 }
 0x125   :  { %3503 = vmatprep.subr.bf16.mxu1 %v3687_v1  ;;  %3647 = vmatprep.subr.bf16.mxu0 %v3687_v1 }
 0x128   :  { %3505 = vmatpush3.bf16.msk.msra.mxu1 %vm4030_vm10, %v3690_v17  ;;  %3649 = vmatpush3.bf16.msk.msra.mxu0 %vm4030_vm10, %v3690_v17 }
 0x12b   :  { %3006 = vmatmul.mubr.f32.vlgmr.msra.gmra.mrb[2].mxu1 %v4286_v16  ;;  %3216 = vmatmul.mubr.f32.vlgmr.msra.gmra.mrb[2].mxu0 %v4288_v19 }
 0x13e   :  { %v500_v15 = vpop.f32.mrb[0].mxu1  ;;  %v795_v21 = vpop.f32.mrb[0].mxu0 }
 0x13f   :  { %v3650_v28 = vadd.f32 %v795_v21, %v500_v15  ;;  %v2692_v34 = vpop.f32.mrb[1].mxu1  ;;  %v2797_v42 = vpop.f32.mrb[1].mxu0 }
 0x1fe   :  { %v1436_v1 = vpop.f32.mrb[2].mxu1  ;;  %v2077_v53 = vpop.f32.mrb[2].mxu0 }
 0x1ff   :  { %v2081_v3 = vmul.f32 %v2077_v53, %v1436_v1  ;;  %v3007_v29 = vpop.f32.mrb[3].mxu1  ;;  %v3217_v39 = vpop.f32.mrb[3].mxu0 }
 0x201   :  { %v2082_v48 = vmax.f32 %v2081_v3, 1e-12 }
 0x203   :  { %3685 = vrsqrt.f32 %v2082_v48 }
 0x20d   :  { %v3686_v17 = vpop.eup %3685 }
 0x20e   :  { %v2084_v60 = vmul.f32 %v3686_v17, %v3650_v28 }
 0x210   :  { %v2086_v10 = vadd.f32 %v2085_v27, %v2084_v60 }
 0x212   :  { %2088 = vst.msk [vmem:[#allocation2] sm:$0xf] %vm49_vm7, %v2086_v10 }
 0x219   :  { %v2092_v59 = vld [vmem:[#allocation2] sm:$0xf] }
 0x21a   :  { %v2093_v23 = vsel %vm49_vm7, %v2092_v59, 0.0 }
 0x21b   :  { %2094 = vadd.xlane.f32.xlu0 %v2093_v23 }
 0x2a8   :  { %v2095_v30 = vpop.xlane.xlu0 %2094 }
 0x2a9   :  { %v2096_v36 = vrot.slane %v2095_v30, 4 }
 0x2ab   :  { %v2097_v11 = vadd.f32 %v2096_v36, %v2095_v30 }
 0x2ad   :  { %v2098_v40 = vrot.slane %v2097_v11, 2 }
 0x2af   :  { %v2099_v4 = vadd.f32 %v2098_v40, %v2097_v11 }
 0x2b1   :  { %v2100_v12 = vrot.slane %v2099_v4, 1 }
 0x2b3   :  { %v2101_v32 = vadd.f32 %v2100_v12, %v2099_v4 }
 0x2b5   :  { %3679 = vpush %v2101_v32 }
 0x2e6   :  { %s3680_s0 = spop %3679 }
 0x2e7   :  { %s2103_s1 = smul.f32 0.0625, %s3680_s0 }
 0x2e9   :  { %v2104_v37 = vstv %s2103_s1 }
 0x2ea   :  { %2105 = vst [vmem:[%s4604_s2] sm:$0xff] %v2104_v37 }

</bundles_post_ra>
